<compile_context>
chip_gen: v7x
topology: tpu7x:2x2x1
jax: 0.10.0
libtpu: 0.0.40
codegen_flags: <defaults>
</compile_context>

<pallas_src>
import functools

import jax
import jax.numpy as jnp
from jax.experimental import pallas as pl
from jax.experimental.pallas import tpu as pltpu


def _round_up(n, m):
    return ((n + m - 1) // m) * m


def _fused_mlp_kernel(w_ref, b_ref, x_ref, o_ref):
    """One MXU matmul per tile on the lane-packed layout.

    x_ref : VMEM [TR, 128]  -- 32 samples x 4 features packed per row
    w_ref : VMEM [128, 160] -- block-diagonal 32x replication of fused [4, 5]
    b_ref : VMEM [1, 160]   -- 32x replicated fused bias
    o_ref : VMEM [TR, 160]  -- 32 samples x 5 outputs packed per row
    """
    o_ref[...] = (
        jnp.dot(x_ref[...], w_ref[...], preferred_element_type=jnp.float32)
        + b_ref[...]
    )


@functools.partial(jax.jit, static_argnames=("tile_rows",))
def model_forward(x, w1, b1, w2, b2, *, tile_rows=2048):
    """x: [B, 4] f32; w1: [4, 4] (in,out); b1: [4]; w2: [4, 5] (in,out); b2: [5]."""
    B, in_f = x.shape
    out_f = w2.shape[1]
    assert in_f == 4 and out_f == 5

    # Fuse the two Linears (valid: no activation between them).
    w_fused = (w1 @ w2).astype(jnp.float32)        # [4, 5]
    b_fused = (b1 @ w2 + b2).astype(jnp.float32)   # [5]

    samples_per_row = 128 // in_f                  # 32 samples per 128-lane row
    packed_out = samples_per_row * out_f           # 160 output lanes per row

    # Pack 32 consecutive samples into one 128-lane row.  The reshape merges
    # contiguous row-major dims -> layout bitcast, no HBM copy.  Padding (one
    # extra pass over x) only happens for ragged batches (B % 32 != 0).
    b_pad = _round_up(B, samples_per_row)
    if b_pad != B:
        x = jnp.pad(x, ((0, b_pad - B), (0, 0)))
    r = b_pad // samples_per_row                   # packed rows
    xp = x.reshape(r, 128)

    # Tiny block-diagonal replicated weights / bias, built once per call.
    # w_big[a*4 + i, a*5 + j] = w_fused[i, j] for a in [0, 32).
    eye = jnp.eye(samples_per_row, dtype=jnp.float32)
    w_big = jnp.einsum("ab,ij->aibj", eye, w_fused).reshape(128, packed_out)
    b_big = jnp.tile(b_fused, samples_per_row).reshape(1, packed_out)

    # Tile-row choice: biggest tile within the VMEM budget, but keep >= 4 grid
    # steps when possible (v7x dual-TC sharding + pipelining).  Non-divisible
    # grids use Pallas' padded last block (OOB output writes are dropped).
    if r <= 8:
        tr = r
    else:
        tr = max(8, min(tile_rows, _round_up(pl.cdiv(r, 4), 8)))
    grid = (pl.cdiv(r, tr),)

    flops = 2 * r * 128 * packed_out
    bytes_accessed = 4 * (r * 128 + r * packed_out + w_big.size + b_big.size)

    out_packed = pl.pallas_call(
        _fused_mlp_kernel,
        out_shape=jax.ShapeDtypeStruct((r, packed_out), jnp.float32),
        grid_spec=pl.GridSpec(
            grid=grid,
            in_specs=[
                # Weights/bias: same block every step -> stay resident in VMEM.
                pl.BlockSpec((128, packed_out), lambda i: (0, 0)),
                pl.BlockSpec((1, packed_out), lambda i: (0, 0)),
                # Packed-activation tiles, pipelined along the batch grid.
                pl.BlockSpec((tr, 128), lambda i: (i, 0)),
            ],
            out_specs=pl.BlockSpec((tr, packed_out), lambda i: (i, 0)),
        ),
        compiler_params=pltpu.CompilerParams(
            # Shard batch tiles across TensorCores (v7x has 2 TCs).
            dimension_semantics=("parallel",),
            # Default scoped VMEM is plenty at tr<=2048; set vmem_limit_bytes
            # here before pushing tile_rows past ~4096 (v5e default is 16 MiB).
        ),
        cost_estimate=pl.CostEstimate(
            flops=flops, transcendentals=0, bytes_accessed=bytes_accessed
        ),
    )(w_big, b_big, xp)

    out = out_packed.reshape(b_pad, out_f)         # free dim-split reshape
    return out[:B] if b_pad != B else out


def init_params(key):
    """Deterministic init mimicking nn.Linear's U(-1/sqrt(fan_in), 1/sqrt(fan_in))."""
    k1, k2, k3, k4 = jax.random.split(key, 4)
    bound1 = 1.0 / jnp.sqrt(4.0)   # inner Linear(4, 4), fan_in = 4
    bound2 = 1.0 / jnp.sqrt(4.0)   # outer Linear(4, 5), fan_in = 4
    # Stored as [in, out] (transposed relative to PyTorch's [out, in]).
    w1 = jax.random.uniform(k1, (4, 4), jnp.float32, -bound1, bound1)
    b1 = jax.random.uniform(k2, (4,),   jnp.float32, -bound1, bound1)
    w2 = jax.random.uniform(k3, (4, 5), jnp.float32, -bound2, bound2)
    b2 = jax.random.uniform(k4, (5,),   jnp.float32, -bound2, bound2)
    return w1, b1, w2, b2


if __name__ == "__main__":
    key = jax.random.PRNGKey(0)
    kx, kp = jax.random.split(key)
    w1, b1, w2, b2 = init_params(kp)

    # Small demo batches: aligned (8), ragged (200, exercises padding path),
    # and multi-step grid (2048, exercises pipelining / parallel grid).
    for B in (8, 200, 2048):
        x = jax.random.normal(jax.random.fold_in(kx, B), (B, 4), jnp.float32)
        out = model_forward(x, w1, b1, w2, b2)
        out = jax.block_until_ready(out)

        # Reference in plain JAX (un-fused, matches the PyTorch forward).
        ref = (x @ w1 + b1) @ w2 + b2
        assert out.shape == (B, 5), out.shape
        assert jnp.allclose(out, ref, atol=1e-5), float(jnp.max(jnp.abs(out - ref)))

    print("KERNEL_OK")
</pallas_src>

<mosaic_0001>
module attributes {stable_mosaic.version = 11 : i64} {
  func.func @_fused_mlp_kernel(%arg0: i32, %arg1: memref<128x160xf32, #tpu.memory_space<vmem>>, %arg2: memref<1x160xf32, #tpu.memory_space<vmem>>, %arg3: memref<1x128xf32, #tpu.memory_space<vmem>>, %arg4: memref<1x160xf32, #tpu.memory_space<vmem>>) attributes {dimension_semantics = [#tpu.dimension_semantics<parallel>], iteration_bounds = array<i64: 1>, scalar_prefetch = 0 : i64, scratch_operands = 0 : i64, tpu.core_type = #tpu.core_type<tc>, window_params = [{pipeline_mode = #tpu.pipeline_mode<synchronous>, transform_indices = @transform_0, window_bounds = array<i64: 128, 160>}, {pipeline_mode = #tpu.pipeline_mode<synchronous>, transform_indices = @transform_1, window_bounds = array<i64: 1, 160>}, {transform_indices = @transform_2, window_bounds = array<i64: 1, 128>}, {transform_indices = @transform_3, window_bounds = array<i64: 1, 160>}]} {
    %c0 = arith.constant 0 : index
    %c0_0 = arith.constant 0 : index
    %0 = vector.load %arg3[%c0, %c0_0] : memref<1x128xf32, #tpu.memory_space<vmem>>, vector<1x128xf32>
    %c0_1 = arith.constant 0 : index
    %c0_2 = arith.constant 0 : index
    %1 = vector.load %arg1[%c0_1, %c0_2] : memref<128x160xf32, #tpu.memory_space<vmem>>, vector<128x160xf32>
    %cst = arith.constant dense<0.000000e+00> : vector<1x160xf32>
    %2 = tpu.matmul %0, %1, %cst {dimension_numbers = #tpu.dot_dimension_numbers<[1], [0], [0], [1], [0, 0, 1, 1], [], []>} : vector<1x128xf32>, vector<128x160xf32>, vector<1x160xf32> -> vector<1x160xf32>
    %c0_3 = arith.constant 0 : index
    %c0_4 = arith.constant 0 : index
    %3 = vector.load %arg2[%c0_3, %c0_4] : memref<1x160xf32, #tpu.memory_space<vmem>>, vector<1x160xf32>
    %4 = arith.addf %2, %3 : vector<1x160xf32>
    %c0_5 = arith.constant 0 : index
    %c0_6 = arith.constant 0 : index
    %5 = vector.load %arg4[%c0_5, %c0_6] : memref<1x160xf32, #tpu.memory_space<vmem>>, vector<1x160xf32>
    tpu.vector_store %arg4[%c0_5, %c0_6], %4 {strides = array<i32>} : memref<1x160xf32, #tpu.memory_space<vmem>>, vector<1x160xf32>,
    return
  }
  func.func @transform_0(%arg0: i32) -> (i32, i32) {
    %c0_i32 = arith.constant 0 : i32
    %c0_i32_0 = arith.constant 0 : i32
    %c0_i32_1 = arith.constant 0 : i32
    return %c0_i32, %c0_i32_0 : i32, i32
  }
  func.func @transform_1(%arg0: i32) -> (i32, i32) {
    %c0_i32 = arith.constant 0 : i32
    %c0_i32_0 = arith.constant 0 : i32
    %c0_i32_1 = arith.constant 0 : i32
    return %c0_i32, %c0_i32_0 : i32, i32
  }
  func.func @transform_2(%arg0: i32) -> (i32, i32) {
    %c0_i32 = arith.constant 0 : i32
    %c0_i32_0 = arith.constant 0 : i32
    return %arg0, %c0_i32 : i32, i32
  }
  func.func @transform_3(%arg0: i32) -> (i32, i32) {
    %c0_i32 = arith.constant 0 : i32
    %c0_i32_0 = arith.constant 0 : i32
    return %arg0, %c0_i32 : i32, i32
  }
}

</mosaic_0001>

<bundles_post_ra>
// kernel: tile.8
= control target key start
LH: loop header
LB: loop body
LE: loop exit
PB: predicated region body
PF: predicated region fallthrough
CT: control target
= control target key end

     0   :  { %s40_s0 = inlined_call_operand.vmem [shape: f32[5], index: 0, kind: input, shape index: {}]   ;;  %s41_s1 = inlined_call_operand.vmem [shape: f32[32,5], index: 1, kind: output, shape index: {}]  }
   0x1   :  { %v4_v0 = vld [vmem:[%s40_s0] ss:$0 sm:$0xff] }
   0x2   :  { %5 = vst [vmem:[%s41_s1] sm:$0xff] %v4_v0  ;;  %12 = vst [vmem:[%s41_s1 + $0x8] sm:$0xff] %v4_v0 }
   0x3   :  { %13 = vst [vmem:[%s41_s1 + $0x10] sm:$0xff] %v4_v0  ;;  %14 = vst [vmem:[%s41_s1 + $0x18] sm:$0xff] %v4_v0 }

// kernel: tile.9
= control target key start
LH: loop header
LB: loop body
LE: loop exit
PB: predicated region body
PF: predicated region fallthrough
CT: control target
= control target key end

     0   :  { %vm9_vm0 = vcmask 23552   ;;  %s279_s12 = smov 125   ;;  %s280_s13 = smov 115   ;;  %vm3_vm1 = vcmask 39936   ;;  %vm13_vm2 = vcmask 15360   ;;  %vm16_vm3 = vcmask 1048552   ;;  %s425_s0 = inlined_call_operand.vmem [shape: f32[32,5], index: 0, kind: input, shape index: {}]   ;;  %s426_s1 = inlined_call_operand.vmem [shape: f32[1,160], index: 1, kind: output, shape index: {}]  }
   0x1   :  { %v215_v0 = vld [vmem:[%s425_s0 + $0x19] sm:$0x1]   ;;  %v218_v3 = vld [vmem:[%s425_s0 + $0x17] sm:$0x1]   ;;  %v217_v4 = vld [vmem:[%s425_s0 + $0x18] sm:$0x1]  }
   0x2   :  { %v216_v1 = vld [vmem:[%s425_s0 + $0x19] sm:$0x1]   ;;  %26 = vrot.lane.b32.xlu1 %v218_v3, %s280_s13  ;;  %v219_v5 = vld [vmem:[%s425_s0 + $0x16] sm:$0x1]   ;;  %s281_s18 = smov 120   ;;  %s282_s19 = smov 110  }
   0x3   :  { %v10_v2 = vsel %vm9_vm0, %v216_v1, %v215_v0  ;;  %v220_v6 = vld [vmem:[%s425_s0 + $0x15] sm:$0x1]   ;;  %v221_v7 = vld [vmem:[%s425_s0 + $0x14] sm:$0x1]   ;;  %s283_s24 = smov 105   ;;  %s284_s25 = smov 100  }
   0x4   :  { %11 = vrot.lane.b32.xlu0 %v10_v2, %s279_s12  ;;  %v222_v8 = vld [vmem:[%s425_s0 + $0x13] sm:$0x1]   ;;  %v223_v9 = vld [vmem:[%s425_s0 + $0x12] sm:$0x1]   ;;  %s285_s30 = smov 95   ;;  %s286_s2 = smov 90  }
   0x5   :  { %v224_v10 = vld [vmem:[%s425_s0 + $0x11] sm:$0x1]   ;;  %v225_v11 = vld [vmem:[%s425_s0 + $0x10] sm:$0x1]   ;;  %v2_v12 = vld [vmem:[%s425_s0] sm:$0x1]  }
   0x6   :  { %32 = vrot.lane.b32.xlu1 %v219_v5, %s282_s19  ;;  %4 = vst.msk [vmem:[#allocation0] sm:$0x1] %vm3_vm1, %v2_v12   ;;  %s287_s9 = smov 85   ;;  %s288_s10 = smov 80   ;;  %v226_v13 = vld [vmem:[%s425_s0 + $0xf] sm:$0x1]  }
   0x7   :  { %v227_v14 = vld [vmem:[%s425_s0 + $0xe] sm:$0x1]   ;;  %s289_s15 = smov 75   ;;  %s290_s16 = smov 70   ;;  %v228_v15 = vld [vmem:[%s425_s0 + $0xd] sm:$0x1]  }
   0x8   :  { %20 = vrot.lane.b32.xlu0 %v217_v4, %s281_s18  ;;  %v229_v16 = vld [vmem:[%s425_s0 + $0xc] sm:$0x1]   ;;  %s291_s21 = smov 65   ;;  %s292_s22 = smov 60   ;;  %v230_v17 = vld [vmem:[%s425_s0 + $0xb] sm:$0x1]  }
   0x9   :  { %v231_v18 = vld [vmem:[%s425_s0 + $0xa] sm:$0x1]   ;;  %s293_s27 = smov 55   ;;  %s294_s28 = smov 50   ;;  %v232_v19 = vld [vmem:[%s425_s0 + $0x9] sm:$0x1]  }
   0xa   :  { %44 = vrot.lane.b32.xlu1 %v221_v7, %s284_s25  ;;  %v233_v20 = vld [vmem:[%s425_s0 + $0x8] sm:$0x1]   ;;  %s295_s4 = smov 45   ;;  %s296_s5 = smov 40   ;;  %v234_v21 = vld [vmem:[%s425_s0 + $0x7] sm:$0x1]  }
   0xb   :  { %v235_v22 = vld [vmem:[%s425_s0 + $0x6] sm:$0x1]   ;;  %s298_s11 = smov 30   ;;  %v236_v23 = vld [vmem:[%s425_s0 + $0x1f] sm:$0x1]   ;;  %s300_s17 = smov 25  }
   0xc   :  { %38 = vrot.lane.b32.xlu0 %v220_v6, %s283_s24  ;;  %v237_v24 = vld [vmem:[%s425_s0 + $0x5] sm:$0x1]   ;;  %v238_v25 = vld [vmem:[%s425_s0 + $0x1e] sm:$0x1]   ;;  %v239_v26 = vld [vmem:[%s425_s0 + $0x4] sm:$0x1]  }
   0xd   :  { %s302_s23 = smov 20   ;;  %v240_v27 = vld [vmem:[%s425_s0 + $0x1d] sm:$0x1]   ;;  %v241_v28 = vld [vmem:[%s425_s0 + $0x3] sm:$0x1]   ;;  %s304_s29 = smov 15  }
   0xe   :  { %56 = vrot.lane.b32.xlu1 %v223_v9, %s286_s2  ;;  %v242_v29 = vld [vmem:[%s425_s0 + $0x1c] sm:$0x1]   ;;  %v243_v30 = vld [vmem:[%s425_s0 + $0x2] sm:$0x1]   ;;  %s306_s6 = smov 10   ;;  %s308_s12 = smov 5  }
   0xf   :  { %v244_v31 = vld [vmem:[%s425_s0 + $0x1b] sm:$0x1]   ;;  %v245_v32 = vld [vmem:[%s425_s0 + $0x1] sm:$0x1]   ;;  %v246_v33 = vld [vmem:[%s425_s0 + $0x1a] sm:$0x1]  }
  0x10   :  { %50 = vrot.lane.b32.xlu0 %v222_v8, %s285_s30  ;;  %s309_s0 = smov 2   ;;  %vm22_vm4 = vcmask 1023936   ;;  %vm28_vm5 = vcmask 982936   ;;  %vm34_vm6 = vcmask 941936   ;;  %vm40_vm7 = vcmask 900936  }
  0x11   :  { %vm46_vm8 = vcmask 859936   ;;  %vm52_vm9 = vcmask 818936   ;;  %vm58_vm10 = vcmask 777936   ;;  %vm64_vm11 = vcmask 736936  }
  0x12   :  { %68 = vrot.lane.b32.xlu1 %v225_v11, %s288_s10  ;;  %s297_s10 = smov 35   ;;  %vm70_vm12 = vcmask 695936   ;;  %vm76_vm13 = vcmask 654936   ;;  %vm82_vm14 = vcmask 613936   ;;  %vm88_vm15 = vcmask 572936  }
  0x13   :  { %vm94_vm0 = vcmask 531936   ;;  %vm100_vm1 = vcmask 490936  }
  0x14   :  { %62 = vrot.lane.b32.xlu0 %v224_v10, %s287_s9 }
  0x16   :  { %80 = vrot.lane.b32.xlu1 %v227_v14, %s290_s16  ;;  %s299_s16 = smov 27  }
  0x18   :  { %74 = vrot.lane.b32.xlu0 %v226_v13, %s289_s15 }
  0x1a   :  { %92 = vrot.lane.b32.xlu1 %v229_v16, %s292_s22  ;;  %s301_s22 = smov 22  }
  0x1c   :  { %86 = vrot.lane.b32.xlu0 %v228_v15, %s291_s21 }
  0x1e   :  { %104 = vrot.lane.b32.xlu1 %v231_v18, %s294_s28  ;;  %s303_s28 = smov 17  }
  0x20   :  { %98 = vrot.lane.b32.xlu0 %v230_v17, %s293_s27 }
  0x22   :  { %116 = vrot.lane.b32.xlu1 %v233_v20, %s296_s5  ;;  %s305_s5 = smov 12  }
  0x24   :  { %110 = vrot.lane.b32.xlu0 %v232_v19, %s295_s4 }
  0x26   :  { %128 = vrot.lane.b32.xlu1 %v235_v22, %s298_s11  ;;  %s307_s11 = smov 7  }
  0x28   :  { %122 = vrot.lane.b32.xlu0 %v234_v21, %s297_s10 }
  0x2a   :  { %141 = vrot.lane.b32.xlu1 %v237_v24, %s300_s17 }
  0x2c   :  { %134 = vrot.lane.b32.xlu0 %v236_v23, %s299_s16 }
  0x2e   :  { %154 = vrot.lane.b32.xlu1 %v239_v26, %s302_s23 }
  0x30   :  { %147 = vrot.lane.b32.xlu0 %v238_v25, %s301_s22 }
  0x32   :  { %167 = vrot.lane.b32.xlu1 %v241_v28, %s304_s29 }
  0x34   :  { %160 = vrot.lane.b32.xlu0 %v240_v27, %s303_s28 }
  0x36   :  { %180 = vrot.lane.b32.xlu1 %v243_v30, %s306_s6 }
  0x38   :  { %173 = vrot.lane.b32.xlu0 %v242_v29, %s305_s5 }
  0x3a   :  { %193 = vrot.lane.b32.xlu1 %v245_v32, %s308_s12 }
  0x3c   :  { %186 = vrot.lane.b32.xlu0 %v244_v31, %s307_s11 }
  0x40   :  { %199 = vrot.lane.b32.xlu0 %v246_v33, %s309_s0 }
  0x74   :  { %v27_v35 = vpop.permute.xlu1 %26  }
  0x76   :  { %v12_v34 = vpop.permute.xlu0 %11  }
  0x77   :  { %15 = vst.msk [vmem:[#allocation0 + $0x8] sm:$0x1] %vm13_vm2, %v12_v34   ;;  %vm106_vm2 = vcmask 449936  }
  0x78   :  { %17 = vst.msk [vmem:[#allocation0] sm:$0x1] %vm16_vm3, %v12_v34   ;;  %v33_v37 = vpop.permute.xlu1 %32   ;;  %vm112_vm3 = vcmask 408936  }
  0x7a   :  { %v21_v36 = vpop.permute.xlu0 %20  }
  0x7b   :  { %23 = vst.msk [vmem:[#allocation0] sm:$0x1] %vm22_vm4, %v21_v36   ;;  %vm118_vm4 = vcmask 367936  }
  0x7c   :  { %29 = vst.msk [vmem:[#allocation0] sm:$0x1] %vm28_vm5, %v27_v35   ;;  %v45_v39 = vpop.permute.xlu1 %44   ;;  %vm124_vm5 = vcmask 326936  }
  0x7d   :  { %35 = vst.msk [vmem:[#allocation0] sm:$0x1] %vm34_vm6, %v33_v37   ;;  %vm130_vm6 = vcmask 285936  }
  0x7e   :  { %v39_v38 = vpop.permute.xlu0 %38  }
  0x7f   :  { %41 = vst.msk [vmem:[#allocation0] sm:$0x1] %vm40_vm7, %v39_v38   ;;  %vm136_vm7 = vcmask 261336  }
  0x80   :  { %47 = vst.msk [vmem:[#allocation0] sm:$0x1] %vm46_vm8, %v45_v39   ;;  %v57_v41 = vpop.permute.xlu1 %56   ;;  %vm143_vm8 = vcmask 244936  }
  0x82   :  { %v51_v40 = vpop.permute.xlu0 %50  }
  0x83   :  { %53 = vst.msk [vmem:[#allocation0] sm:$0x1] %vm52_vm9, %v51_v40   ;;  %vm149_vm9 = vcmask 220336  }
  0x84   :  { %59 = vst.msk [vmem:[#allocation0] sm:$0x1] %vm58_vm10, %v57_v41   ;;  %v69_v43 = vpop.permute.xlu1 %68   ;;  %vm156_vm10 = vcmask 203936  }
  0x86   :  { %v63_v42 = vpop.permute.xlu0 %62  }
  0x87   :  { %65 = vst.msk [vmem:[#allocation0] sm:$0x1] %vm64_vm11, %v63_v42   ;;  %vm162_vm11 = vcmask 179336  }
  0x88   :  { %71 = vst.msk [vmem:[#allocation0] sm:$0x1] %vm70_vm12, %v69_v43   ;;  %v81_v45 = vpop.permute.xlu1 %80   ;;  %vm169_vm12 = vcmask 162936  }
  0x8a   :  { %v75_v44 = vpop.permute.xlu0 %74  }
  0x8b   :  { %77 = vst.msk [vmem:[#allocation0] sm:$0x1] %vm76_vm13, %v75_v44   ;;  %vm175_vm13 = vcmask 138336  }
  0x8c   :  { %83 = vst.msk [vmem:[#allocation0] sm:$0x1] %vm82_vm14, %v81_v45   ;;  %v93_v47 = vpop.permute.xlu1 %92   ;;  %vm182_vm14 = vcmask 121936  }
  0x8e   :  { %v87_v46 = vpop.permute.xlu0 %86  }
  0x8f   :  { %89 = vst.msk [vmem:[#allocation0] sm:$0x1] %vm88_vm15, %v87_v46   ;;  %vm188_vm15 = vcmask 97336  }
  0x90   :  { %95 = vst.msk [vmem:[#allocation0] sm:$0x1] %vm94_vm0, %v93_v47   ;;  %v105_v49 = vpop.permute.xlu1 %104   ;;  %vm195_vm0 = vcmask 80936  }
  0x92   :  { %v99_v48 = vpop.permute.xlu0 %98  }
  0x93   :  { %101 = vst.msk [vmem:[#allocation0] sm:$0x1] %vm100_vm1, %v99_v48   ;;  %vm201_vm1 = vcmask 56336  }
  0x94   :  { %107 = vst.msk [vmem:[#allocation0] sm:$0x1] %vm106_vm2, %v105_v49   ;;  %v117_v51 = vpop.permute.xlu1 %116  }
  0x96   :  { %v111_v50 = vpop.permute.xlu0 %110  }
  0x97   :  { %113 = vst.msk [vmem:[#allocation0] sm:$0x1] %vm112_vm3, %v111_v50  }
  0x98   :  { %119 = vst.msk [vmem:[#allocation0] sm:$0x1] %vm118_vm4, %v117_v51   ;;  %v129_v53 = vpop.permute.xlu1 %128  }
  0x9a   :  { %v123_v52 = vpop.permute.xlu0 %122  }
  0x9b   :  { %125 = vst.msk [vmem:[#allocation0] sm:$0x1] %vm124_vm5, %v123_v52  }
  0x9c   :  { %131 = vst.msk [vmem:[#allocation0] sm:$0x1] %vm130_vm6, %v129_v53   ;;  %v142_v55 = vpop.permute.xlu1 %141  }
  0x9d   :  { %144 = vst.msk [vmem:[#allocation0] sm:$0x1] %vm143_vm8, %v142_v55  }
  0x9e   :  { %v135_v54 = vpop.permute.xlu0 %134  }
  0x9f   :  { %138 = vst.msk [vmem:[#allocation0 + $0x8] sm:$0x1] %vm136_vm7, %v135_v54  }
  0xa0   :  { %v155_v57 = vpop.permute.xlu1 %154  }
  0xa1   :  { %157 = vst.msk [vmem:[#allocation0] sm:$0x1] %vm156_vm10, %v155_v57  }
  0xa2   :  { %v148_v56 = vpop.permute.xlu0 %147  }
  0xa3   :  { %151 = vst.msk [vmem:[#allocation0 + $0x8] sm:$0x1] %vm149_vm9, %v148_v56  }
  0xa4   :  { %v168_v59 = vpop.permute.xlu1 %167  }
  0xa5   :  { %170 = vst.msk [vmem:[#allocation0] sm:$0x1] %vm169_vm12, %v168_v59  }
  0xa6   :  { %v161_v58 = vpop.permute.xlu0 %160  }
  0xa7   :  { %164 = vst.msk [vmem:[#allocation0 + $0x8] sm:$0x1] %vm162_vm11, %v161_v58  }
  0xa8   :  { %v181_v61 = vpop.permute.xlu1 %180  }
  0xa9   :  { %183 = vst.msk [vmem:[#allocation0] sm:$0x1] %vm182_vm14, %v181_v61  }
  0xaa   :  { %v174_v60 = vpop.permute.xlu0 %173  }
  0xab   :  { %177 = vst.msk [vmem:[#allocation0 + $0x8] sm:$0x1] %vm175_vm13, %v174_v60  }
  0xac   :  { %v194_v63 = vpop.permute.xlu1 %193  }
  0xad   :  { %196 = vst.msk [vmem:[#allocation0] sm:$0x1] %vm195_vm0, %v194_v63  }
  0xae   :  { %v187_v62 = vpop.permute.xlu0 %186  }
  0xaf   :  { %190 = vst.msk [vmem:[#allocation0 + $0x8] sm:$0x1] %vm188_vm15, %v187_v62  }
  0xb2   :  { %v200_v0 = vpop.permute.xlu0 %199  }
  0xb3   :  { %203 = vst.msk [vmem:[#allocation0 + $0x8] sm:$0x1] %vm201_vm1, %v200_v0  }
  0xb4   :  { %v207_v1 = vld [vmem:[#allocation0] sm:$0x1] }
  0xb5   :  { %209 = vst [vmem:[%s426_s1] sm:$0x1] %v207_v1 }
  0xba   :  { %v211_v2 = vld [vmem:[#allocation0 + $0x8] sm:$0x1] }
  0xbb   :  { %247 = vst [vmem:[%s426_s1 + $0x1] sm:$0x1] %v211_v2 }

// kernel: model_forward.1
= control target key start
LH: loop header
LB: loop body
LE: loop exit
PB: predicated region body
PF: predicated region fallthrough
CT: control target
= control target key end

     0   :  { %v191_v3 = vmov 0.0   ;;  %v49_v50 = vlaneseq  ;;  %v192_v55 = vmov 1966171168   ;;  %s318_s0 = inlined_call_operand.vmem [shape: f32[128,160], index: 0, kind: input, shape index: {}]   ;;  %s319_s2 = inlined_call_operand.vmem [shape: f32[1,128], index: 2, kind: input, shape index: {}]   ;;  %s320_s1 = inlined_call_operand.vmem [shape: f32[1,160], index: 1, kind: input, shape index: {}]   ;;  %s321_s3 = inlined_call_operand.vmem [shape: f32[1,160], index: 3, kind: output, shape index: {}]  }
   0x1   :  { %v16_v0 = vld [vmem:[%s318_s0 + $0x8] sm:$0xff]  ;;  %v18_v1 = vld [vmem:[%s318_s0 + $0x18] sm:$0xff]  ;;  %v15_v2 = vld [vmem:[%s318_s0] sm:$0xff]  ;;  %123 = vmatprep.mubr.f32.mxu0 %v191_v3  ;;  %v134_v56 = vunpack.c.l.s4 %v192_v55 }
   0x2   :  { %v157_v4 = vpack.c.bf16 %v18_v1, %v16_v0  ;;  %v17_v5 = vld [vmem:[%s318_s0 + $0x10] sm:$0xff]  ;;  %v20_v6 = vld [vmem:[%s318_s0 + $0x28] sm:$0xff]  ;;  %v22_v7 = vld [vmem:[%s318_s0 + $0x38] sm:$0xff]  ;;  %v50_v51 = vshrl.u32 %v49_v50, 7  ;;  %vm150_vm0 = vcmp.lt.s32.totalorder %v49_v50, 160 }
   0x3   :  { %v159_v8 = vpack.c.bf16 %v17_v5, %v15_v2  ;;  %v161_v9 = vpack.c.bf16 %v22_v7, %v20_v6  ;;  %v19_v10 = vld [vmem:[%s318_s0 + $0x20] sm:$0xff]  ;;  %v21_v11 = vld [vmem:[%s318_s0 + $0x30] sm:$0xff]  ;;  %v24_v12 = vld [vmem:[%s318_s0 + $0x48] sm:$0xff]  ;;  %v135_v59 = vunpack.c.0.s8 %v134_v56 }
   0x4   :  { %158 = vmatprep.subr.bf16.mxu0 %v157_v4  ;;  %v26_v13 = vld [vmem:[%s318_s0 + $0x58] sm:$0xff]  ;;  %v163_v14 = vpack.c.bf16 %v21_v11, %v19_v10  ;;  %v23_v16 = vld [vmem:[%s318_s0 + $0x40] sm:$0xff]  ;;  %v25_v17 = vld [vmem:[%s318_s0 + $0x50] sm:$0xff]  ;;  %v51_v52 = vsub.s32 0, %v50_v51  ;;  %v55_v54 = vsub.s32 1, %v50_v51 }
   0x5   :  { %160 = vmatpush1.bf16.msra.mxu0 %v159_v8  ;;  %v165_v15 = vpack.c.bf16 %v26_v13, %v24_v12  ;;  %v28_v18 = vld [vmem:[%s318_s0 + $0x68] sm:$0xff]  ;;  %v30_v19 = vld [vmem:[%s318_s0 + $0x78] sm:$0xff]  ;;  %v167_v20 = vpack.c.bf16 %v25_v17, %v23_v16  ;;  %v27_v22 = vld [vmem:[%s318_s0 + $0x60] sm:$0xff]  ;;  %v138_v0 = vsub.s32 %v135_v59, %v50_v51 }
   0x6   :  { %162 = vmatprep.subr.bf16.mxu0 %v161_v9  ;;  %v169_v21 = vpack.c.bf16 %v30_v19, %v28_v18  ;;  %v29_v23 = vld [vmem:[%s318_s0 + $0x70] sm:$0xff]  ;;  %v32_v24 = vld [vmem:[%s318_s0 + $0x88] sm:$0xff]  ;;  %v34_v25 = vld [vmem:[%s318_s0 + $0x98] sm:$0xff] }
   0x7   :  { %v171_v26 = vpack.c.bf16 %v29_v23, %v27_v22  ;;  %v173_v27 = vpack.c.bf16 %v34_v25, %v32_v24  ;;  %v31_v28 = vld [vmem:[%s318_s0 + $0x80] sm:$0xff]  ;;  %v33_v29 = vld [vmem:[%s318_s0 + $0x90] sm:$0xff]  ;;  %v36_v30 = vld [vmem:[%s318_s0 + $0xa8] sm:$0xff] }
   0x8   :  { %v38_v31 = vld [vmem:[%s318_s0 + $0xb8] sm:$0xff]  ;;  %v175_v32 = vpack.c.bf16 %v33_v29, %v31_v28  ;;  %v35_v34 = vld [vmem:[%s318_s0 + $0xa0] sm:$0xff]  ;;  %v37_v35 = vld [vmem:[%s318_s0 + $0xb0] sm:$0xff] }
   0x9   :  { %164 = vmatpush1.bf16.msra.mxu0 %v163_v14  ;;  %v177_v33 = vpack.c.bf16 %v38_v31, %v36_v30  ;;  %v40_v36 = vld [vmem:[%s318_s0 + $0xc8] sm:$0xff]  ;;  %v42_v37 = vld [vmem:[%s318_s0 + $0xd8] sm:$0xff]  ;;  %v179_v38 = vpack.c.bf16 %v37_v35, %v35_v34  ;;  %v39_v40 = vld [vmem:[%s318_s0 + $0xc0] sm:$0xff] }
   0xa   :  { %166 = vmatprep.subr.bf16.mxu0 %v165_v15  ;;  %v181_v39 = vpack.c.bf16 %v42_v37, %v40_v36  ;;  %v41_v41 = vld [vmem:[%s318_s0 + $0xd0] sm:$0xff]  ;;  %v44_v42 = vld [vmem:[%s318_s0 + $0xe8] sm:$0xff]  ;;  %v46_v43 = vld [vmem:[%s318_s0 + $0xf8] sm:$0xff] }
   0xb   :  { %v183_v44 = vpack.c.bf16 %v41_v41, %v39_v40  ;;  %v185_v45 = vpack.c.bf16 %v46_v43, %v44_v42  ;;  %v43_v46 = vld [vmem:[%s318_s0 + $0xe0] sm:$0xff]  ;;  %v45_v47 = vld [vmem:[%s318_s0 + $0xf0] sm:$0xff] }
   0xc   :  { %v187_v48 = vpack.c.bf16 %v45_v47, %v43_v46  ;;  %v14_v49 = vld [vmem:[%s319_s2] sm:$0x1] }
   0xd   :  { %168 = vmatpush1.bf16.msra.mxu0 %v167_v20  ;;  %v47_v53 = vld [vmem:[%s320_s1] sm:$0x3] }
   0xe   :  { %170 = vmatprep.subr.bf16.mxu0 %v169_v21  ;;  %v52_v57 = vrot.slane %v47_v53, %v51_v52  ;;  %v56_v58 = vrot.slane %v47_v53, %v55_v54 }
  0x11   :  { %172 = vmatpush1.bf16.msra.mxu0 %v171_v26 }
  0x12   :  { %174 = vmatprep.subr.bf16.mxu0 %v173_v27 }
  0x15   :  { %176 = vmatpush1.bf16.msra.mxu0 %v175_v32 }
  0x16   :  { %178 = vmatprep.subr.bf16.mxu0 %v177_v33 }
  0x19   :  { %180 = vmatpush1.bf16.msra.mxu0 %v179_v38 }
  0x1a   :  { %182 = vmatprep.subr.bf16.mxu0 %v181_v39 }
  0x1d   :  { %184 = vmatpush1.bf16.msra.mxu0 %v183_v44 }
  0x1e   :  { %186 = vmatprep.subr.bf16.mxu0 %v185_v45 }
  0x21   :  { %188 = vmatpush1.bf16.msra.mxu0 %v187_v48 }
  0x24   :  { %124 = vmatmul.mubr.f32.vlgmr.msra.gmra.mrb[0].mxu0 %v14_v49 }
  0xf7   :  { %v125_v60 = vpop.f32.mrb[0].mxu0 }
  0xf8   :  { %v126_v61 = vadd.f32 %v125_v60, %v52_v57  ;;  %v127_v62 = vpop.f32.mrb[1].mxu0 }
  0xf9   :  { %v128_v63 = vadd.f32 %v127_v62, %v56_v58 }
  0xfb   :  { %v132_v1 = vcombine.low %v126_v61, %v128_v63 }
  0xfd   :  { %v139_v2 = vrot.slane %v132_v1, %v138_v0 }
  0xff   :  { %v146_v3 = vrot.slane %v139_v2, %v138_v0 }
 0x101   :  { %152 = vst.msk [vmem:[%s321_s3] sm:$0x3] %vm150_vm0, %v146_v3 }

</bundles_post_ra>
